<compile_context>
chip_gen: v6e
topology: v6e:2x2x1
jax: 0.10.0
libtpu: 0.0.40
codegen_flags: <defaults>
</compile_context>

<pallas_src>
import functools

import jax
import jax.numpy as jnp
from jax import lax
from jax.experimental import pallas as pl
from jax.experimental.pallas import tpu as pltpu

SAFETY_WEIGHT = 1.0
CONTEXT_WEIGHT = 0.5
HIER_W_COMMAND = 0.6
HIER_W_CATEGORY = 0.4
TOPK = 5
NEG = -1e30
NC_PAD = 128            # lane-padded category dimension
INT32_MIN = -(2 ** 31)


def _automotive_partial_kernel(num_categories, true_b, tb, tiles_per_split,
                               needs_mask,
                               logits_ref, side_ref, ctx_ref, w_ref, b_ref,
                               cat_map_ref, out_ref, acc_ref, catf_ref):
    c = pl.program_id(0)          # core-split axis ("parallel")
    i = pl.program_id(1)          # batch-tile axis ("arbitrary", reduction)
    nsteps = pl.num_programs(1)

    @pl.when(i == 0)
    def _():
        acc_ref[...] = jnp.zeros_like(acc_ref)
        # hoist the bf16 -> f32 cast of the command->category table out of the
        # per-step body (cast once per reduction sweep, not per grid step).
        catf_ref[...] = cat_map_ref[...].astype(jnp.float32)

    # Global (unclamped) tile index; rows past true_b (and duplicate clamped
    # tiles) are neutralized in the masked slow path.
    t = c * tiles_per_split + i

    def accumulate(ce_s, wce_s, cos_s, cat_s):
        lane = lax.broadcasted_iota(jnp.int32, acc_ref.shape, 1)
        acc_ref[...] += (jnp.where(lane == 0, ce_s, 0.0)
                         + jnp.where(lane == 1, wce_s, 0.0)
                         + jnp.where(lane == 2, cos_s, 0.0)
                         + jnp.where(lane == 3, cat_s, 0.0))

    def compute(masked):
        # Unpack the (tb, 3) side array with elementwise select+reduce (no
        # unaligned lane slicing): [label, safety, category_label].
        side = side_ref[...].astype(jnp.float32)          # (tb, 3)
        sidx = lax.broadcasted_iota(jnp.int32, side.shape, 1)

        def pickcol(j):
            return jnp.sum(jnp.where(sidx == j, side, 0.0), axis=-1,
                           keepdims=True)

        labels = pickcol(0).astype(jnp.int32)             # exact for < 2^24
        safety = pickcol(1)
        cat_lab = pickcol(2).astype(jnp.int32)

        logits = logits_ref[...].astype(jnp.float32)      # (tb, V)
        ctx = ctx_ref[...].astype(jnp.float32)            # (tb, F)

        if masked:
            row = lax.broadcasted_iota(jnp.int32, (tb, 1), 0)
            valid = (t * tb + row) < true_b               # (tb, 1) bool
            maskf = valid.astype(jnp.float32)
            # Sanitize garbage rows of a partial tile BEFORE exp/sqrt so
            # NaN/Inf can't leak through the mask multiply.
            logits = jnp.where(valid, logits, 0.0)
            safety = jnp.where(valid, safety, 1.0)
            ctx = jnp.where(valid, ctx, 0.0)

        V = logits.shape[-1]
        col = lax.broadcasted_iota(jnp.int32, (tb, V), 1)

        # ---- fused per-sample cross entropy over the command vocabulary ----
        # TODO(synk): out-of-range labels silently yield ce = logsumexp
        # (PyTorch would raise); kept silent to stay a pure kernel.
        m = jnp.max(logits, axis=-1, keepdims=True)
        lse = m + jnp.log(jnp.sum(jnp.exp(logits - m), axis=-1, keepdims=True))
        label_logit = jnp.sum(jnp.where(col == labels, logits, 0.0),
                              axis=-1, keepdims=True)
        ce = lse - label_logit                            # (tb, 1)

        # ---- SafetyAwareLoss: ce * (1 + (1 - s) * w_safety) ----------------
        wce = ce * (1.0 + (1.0 - safety) * SAFETY_WEIGHT)

        # ---- CommandContextLoss: rank-1 cosine ------------------------------
        # TODO(synk): reference does logits.mean(dim=1) (rank quirk for 2-D
        # logits) and re-creates nn.Linear(in_features, 768) at forward time;
        # mirrored as a fixed deterministic Linear(1, 768) whose params are
        # passed in.  The reference's re-normalization of already-unit vectors
        # (1e-8 clamp) is dropped: it only differs for norms < 1e-12.
        la = jnp.mean(logits, axis=-1, keepdims=True)     # (tb, 1)
        w = w_ref[...].astype(jnp.float32)                # (1, F)
        b = b_ref[...].astype(jnp.float32)
        cw = jnp.sum(ctx * w, axis=-1, keepdims=True)
        cb = jnp.sum(ctx * b, axis=-1, keepdims=True)
        cc = jnp.sum(ctx * ctx, axis=-1, keepdims=True)
        ww = jnp.sum(w * w)
        wb = jnp.sum(w * b)
        bb = jnp.sum(b * b)
        proj_norm = jnp.sqrt(jnp.maximum(la * la * ww + 2.0 * la * wb + bb, 0.0))
        ctx_norm = jnp.sqrt(cc)
        cos = (la * cw + cb) / (jnp.maximum(proj_norm, 1e-12) *
                                jnp.maximum(ctx_norm, 1e-12))

        # ---- HierarchicalCommandLoss: top-k scattered into categories -------
        # Packed-key top-k: order-preserving int key, low bits replaced with
        # (V-1-col).  One int max-reduce per round; unique keys make
        # `packed >= kth_max` select exactly k entries (lowest index on ties).
        k = min(TOPK, V)
        nbits = max(1, (V - 1).bit_length())
        bits = pltpu.bitcast(logits, jnp.int32)
        ikey = jnp.where(bits < 0, jnp.int32(INT32_MIN) - bits, bits)
        packed = (ikey & jnp.int32(-(1 << nbits))) | (jnp.int32(V - 1) - col)
        thresh = jnp.max(packed, axis=-1, keepdims=True)
        for _ in range(k - 1):                            # static unroll (k<=5)
            thresh = jnp.max(
                jnp.where(packed < thresh, packed, jnp.int32(INT32_MIN)),
                axis=-1, keepdims=True)
        sel = (packed >= thresh).astype(jnp.float32)      # exactly k ones/row

        cat_raw = jnp.dot(logits * sel, catf_ref[...],
                          preferred_element_type=jnp.float32)  # (tb, NC_PAD)
        ccol = lax.broadcasted_iota(jnp.int32, (tb, NC_PAD), 1)
        cat_logits = jnp.where(ccol < num_categories, cat_raw, NEG)
        m2 = jnp.max(cat_logits, axis=-1, keepdims=True)
        lse2 = m2 + jnp.log(jnp.sum(jnp.exp(cat_logits - m2), axis=-1,
                                    keepdims=True))
        cat_label_logit = jnp.sum(
            jnp.where(ccol == cat_lab, cat_logits, 0.0), axis=-1, keepdims=True)
        cat_ce = lse2 - cat_label_logit

        if masked:
            accumulate(jnp.sum(ce * maskf), jnp.sum(wce * maskf),
                       jnp.sum(cos * maskf), jnp.sum(cat_ce * maskf))
        else:
            accumulate(jnp.sum(ce), jnp.sum(wce),
                       jnp.sum(cos), jnp.sum(cat_ce))

    if needs_mask:
        full = (t * tb + tb) <= true_b

        @pl.when(full)
        def _():
            compute(False)

        @pl.when(jnp.logical_not(full))
        def _():
            compute(True)
    else:
        compute(False)

    @pl.when(i == nsteps - 1)
    def _():
        out_ref[0] = acc_ref[...]


def _default_core_splits():
    """2 only on dual-TensorCore chips (v4 / v5p / v7x); 1 on v5e / v6e."""
    try:
        kind = jax.devices()[0].device_kind.lower()
    except Exception:
        return 1
    if "v7" in kind or "v4" in kind or "v5p" in kind:
        return 2
    return 1


def _vmem_capacity_bytes():
    try:
        info = pltpu.get_tpu_info()
        cap = getattr(info, "vmem_capacity_bytes", None)
        if cap:
            return int(cap)
    except Exception:
        pass
    return 64 << 20      # conservative (v7x per-core VMEM)


def _choose_tb(batch, vocab, feat, logits_isz, ctx_isz, vmem_cap):
    """Batch-tile rows from per-row VMEM cost, incl. in-kernel temporaries."""
    resident = vocab * NC_PAD * (2 * 2 + 4) + 4 * feat * 4          # tables
    stream = 2 * (vocab * logits_isz + feat * ctx_isz) + 2 * 128 * 4  # dbl-buf
    temps = 6 * vocab * 4 + 2 * feat * 4                            # live f32
    per_row = stream + temps
    budget = min(max(vmem_cap // 3, 4 << 20), 24 << 20) - resident
    budget = max(budget, per_row * 16)
    tb = budget // per_row
    cap = 2048 if vmem_cap >= (96 << 20) else 1024
    tb = int(min(tb, cap, batch))
    if tb >= batch:
        return int(batch)
    return max(16, (tb // 16) * 16)      # packed-sublane (bf16) alignment


@functools.partial(
    jax.jit, static_argnames=("num_categories", "batch_tile", "num_core_splits"))
def automotive_loss(logits, labels, safety_scores, context_features,
                    category_labels, proj_w, proj_b, cmd2cat, *,
                    num_categories, batch_tile=None, num_core_splits=None):
    B, V = logits.shape
    F = context_features.shape[-1]
    assert num_categories <= NC_PAD, "num_categories exceeds lane padding (128)"

    vmem_cap = _vmem_capacity_bytes()
    lsz = jnp.dtype(logits.dtype).itemsize
    csz = jnp.dtype(context_features.dtype).itemsize
    tb = (batch_tile if batch_tile is not None
          else _choose_tb(B, V, F, lsz, csz, vmem_cap))
    n_tiles = pl.cdiv(B, tb)
    nsplit = (num_core_splits if num_core_splits is not None
              else _default_core_splits())
    nsplit = max(1, min(int(nsplit), n_tiles))
    tps = pl.cdiv(n_tiles, nsplit)
    last = n_tiles - 1
    # Only emit masking code when a ragged last tile / duplicate tile exists.
    needs_mask = (B % tb != 0) or (nsplit * tps != n_tiles)

    def batch_map(c, i):
        return (jnp.minimum(c * tps + i, last), 0)

    def const_map(c, i):
        return (0, 0)

    # Pack the three per-row scalars into one (B, 3) side array: one BlockSpec,
    # one DMA, one lane-padded VMEM buffer instead of three.
    side = jnp.stack([labels.reshape(B).astype(jnp.float32),
                      safety_scores.reshape(B).astype(jnp.float32),
                      category_labels.reshape(B).astype(jnp.float32)], axis=-1)

    in_specs = [
        pl.BlockSpec((tb, V), batch_map),        # logits
        pl.BlockSpec((tb, 3), batch_map),        # packed side scalars
        pl.BlockSpec((tb, F), batch_map),        # context features
        pl.BlockSpec((1, F), const_map),         # proj_w  (resident)
        pl.BlockSpec((1, F), const_map),         # proj_b  (resident)
        pl.BlockSpec((V, NC_PAD), const_map),    # cmd->cat one-hot (bf16)
    ]
    out_spec = pl.BlockSpec((1, 8, 128), lambda c, i: (c, 0, 0))

    # VMEM estimate including in-kernel temporaries (review: generation-aware).
    est_vmem = (2 * tb * (V * lsz + F * csz)     # streamed inputs (x2 buffers)
                + 2 * tb * 128 * 4               # packed side (lane-padded, x2)
                + tb * (6 * V + 2 * F) * 4       # live in-kernel temporaries
                + 2 * V * NC_PAD * 2             # resident bf16 one-hot (x2)
                + V * NC_PAD * 4                 # f32 scratch copy
                + 4 * F * 4                      # proj_w / proj_b
                + 3 * 8 * 128 * 4)               # acc scratch + out block
    cap_limit = min(int(vmem_cap * 3 // 4), 96 << 20)   # ~48 MiB on v7x
    vmem_limit = int(min(cap_limit, max(est_vmem + (4 << 20), 16 << 20)))

    cparams = pltpu.CompilerParams(
        dimension_semantics=("parallel", "arbitrary"),
        vmem_limit_bytes=vmem_limit)
    cost = pl.CostEstimate(
        flops=int(2 * B * V * NC_PAD + 30 * B * V + 10 * B * F),
        transcendentals=int(B * (V + NC_PAD + 4)),
        bytes_accessed=int(B * (V * lsz + F * csz + 12)
                           + 2 * V * NC_PAD + 8 * F + nsplit * 4096))

    kernel = functools.partial(_automotive_partial_kernel,
                               num_categories, B, tb, tps, needs_mask)

    partials = pl.pallas_call(
        kernel,
        grid=(nsplit, tps),
        in_specs=in_specs,
        out_specs=out_spec,
        out_shape=jax.ShapeDtypeStruct((nsplit, 8, 128), jnp.float32),
        scratch_shapes=[pltpu.VMEM((8, 128), jnp.float32),       # acc sums
                        pltpu.VMEM((V, NC_PAD), jnp.float32)],   # f32 cat map
        compiler_params=cparams,
        cost_estimate=cost,
    )(logits, side, context_features, proj_w, proj_b, cmd2cat)

    # tiny finalize in JAX: divide masked sums by the true batch size.
    s = jnp.sum(partials[:, 0, :4], axis=0)
    bf = jnp.float32(B)
    command_loss = s[0] / bf
    safety_loss = s[1] / bf
    consistency = 1.0 - s[2] / bf
    context_loss = command_loss + CONTEXT_WEIGHT * consistency
    category_loss = s[3] / bf
    hierarchical_loss = (HIER_W_COMMAND * command_loss
                         + HIER_W_CATEGORY * category_loss)
    total = safety_loss + context_loss + hierarchical_loss
    return {"total_loss": total, "safety_loss": safety_loss,
            "context_loss": context_loss, "hierarchical_loss": hierarchical_loss}


def build_cmd2cat_onehot(command_hierarchy, vocab_size, nc_pad=NC_PAD):
    """Host-side: command index -> category one-hot (with the %-wrap of the ref).

    Stored as bf16 (values exactly 0/1); the kernel casts once into an f32 VMEM
    scratch and accumulates the matmul in f32.
    """
    sizes = [len(v) for v in command_hierarchy.values()]
    total = sum(sizes)
    rows = []
    for c in range(vocab_size):
        cm = c % total
        row = [0.0] * nc_pad
        running = 0
        for j, s in enumerate(sizes):
            if running <= cm < running + s:
                row[j] = 1.0
                break
            running += s
        rows.append(row)
    return jnp.asarray(rows, dtype=jnp.bfloat16)


def reference_loss(logits, labels, safety, ctx, cat_labels, w, b, hierarchy):
    """Pure-JAX mirror of the PyTorch forward semantics (same shape choices)."""
    B, V = logits.shape
    logp = jax.nn.log_softmax(logits, axis=-1)
    ce = -jnp.take_along_axis(logp, labels[:, None], axis=-1)[:, 0]
    command_loss = ce.mean()
    safety_loss = (ce * (1.0 + (1.0 - safety) * SAFETY_WEIGHT)).mean()

    logits_avg = logits.mean(axis=-1, keepdims=True)
    proj = logits_avg * w + b
    pn = proj / jnp.maximum(jnp.linalg.norm(proj, axis=-1, keepdims=True), 1e-12)
    cn = ctx / jnp.maximum(jnp.linalg.norm(ctx, axis=-1, keepdims=True), 1e-12)
    cos = (pn * cn).sum(-1) / (jnp.maximum(jnp.linalg.norm(pn, axis=-1), 1e-8) *
                               jnp.maximum(jnp.linalg.norm(cn, axis=-1), 1e-8))
    context_loss = command_loss + CONTEXT_WEIGHT * (1.0 - cos.mean())

    sizes = [len(v) for v in hierarchy.values()]
    total_cmds, nc = sum(sizes), len(sizes)
    cat_of = []
    for c in range(V):
        cm, running = c % total_cmds, 0
        for j, s in enumerate(sizes):
            if running <= cm < running + s:
                cat_of.append(j)
                break
            running += s
    cat_of = jnp.asarray(cat_of, dtype=jnp.int32)
    k = min(TOPK, V)
    _, idxs = lax.top_k(logits, k)
    vals = jnp.take_along_axis(logits, idxs, axis=-1)
    cats = cat_of[idxs]
    cat_logits = jnp.zeros((B, nc), jnp.float32).at[
        jnp.arange(B)[:, None], cats].add(vals)
    clogp = jax.nn.log_softmax(cat_logits, axis=-1)
    cce = -jnp.take_along_axis(clogp, cat_labels[:, None], axis=-1)[:, 0]
    hier = HIER_W_COMMAND * command_loss + HIER_W_CATEGORY * cce.mean()
    return {"total_loss": safety_loss + context_loss + hier,
            "safety_loss": safety_loss, "context_loss": context_loss,
            "hierarchical_loss": hier}


if __name__ == "__main__":
    B, V, F = 8, 16, 768
    hierarchy = {
        "navigation": ["navigate_to", "reroute", "cancel_route", "show_map"],
        "climate": ["set_temperature", "fan_speed", "defrost"],
        "media": ["play_music", "pause", "next_track", "prev_track", "volume"],
    }
    NC = len(hierarchy)

    key = jax.random.PRNGKey(0)
    k1, k2, k3, k4, k5, k6, k7 = jax.random.split(key, 7)
    logits = jax.random.normal(k1, (B, V), jnp.float32)
    labels = jax.random.randint(k2, (B,), 0, V)
    safety_scores = jax.random.uniform(k3, (B,), jnp.float32)
    context_features = jax.random.normal(k4, (B, F), jnp.float32)
    category_labels = jax.random.randint(k5, (B,), 0, NC)
    # deterministic Linear(1, 768) params (uniform(-1, 1), fan_in = 1)
    proj_w = jax.random.uniform(k6, (1, F), jnp.float32, -1.0, 1.0)
    proj_b = jax.random.uniform(k7, (1, F), jnp.float32, -1.0, 1.0)
    cmd2cat = build_cmd2cat_onehot(hierarchy, V)

    out = automotive_loss(logits, labels, safety_scores, context_features,
                          category_labels, proj_w, proj_b, cmd2cat,
                          num_categories=NC)
    out = jax.block_until_ready(out)

    ref = reference_loss(logits, labels, safety_scores, context_features,
                         category_labels, proj_w, proj_b, hierarchy)
    for name in ("total_loss", "safety_loss", "context_loss", "hierarchical_loss"):
        assert bool(jnp.isfinite(out[name])), name
        assert bool(jnp.allclose(out[name], ref[name], rtol=1e-4, atol=1e-4)), (
            name, out[name], ref[name])

    print("KERNEL_OK")
</pallas_src>

<mosaic_0001>
module attributes {stable_mosaic.version = 11 : i64} {
  func.func @_automotive_partial_kernel(%arg0: i32, %arg1: i32, %arg2: memref<8x16xf32, #tpu.memory_space<vmem>>, %arg3: memref<8x3xf32, #tpu.memory_space<vmem>>, %arg4: memref<8x768xf32, #tpu.memory_space<vmem>>, %arg5: memref<1x768xf32, #tpu.memory_space<vmem>>, %arg6: memref<1x768xf32, #tpu.memory_space<vmem>>, %arg7: memref<16x128xbf16, #tpu.memory_space<vmem>>, %arg8: memref<1x8x128xf32, #tpu.memory_space<vmem>>, %arg9: memref<8x128xf32, #tpu.memory_space<vmem>>, %arg10: memref<16x128xf32, #tpu.memory_space<vmem>>) attributes {dimension_semantics = [#tpu.dimension_semantics<parallel>, #tpu.dimension_semantics<arbitrary>], iteration_bounds = array<i64: 1, 1>, scalar_prefetch = 0 : i64, scratch_operands = 2 : i64, tpu.core_type = #tpu.core_type<tc>, window_params = [{transform_indices = @transform_0, window_bounds = array<i64: 8, 16>}, {transform_indices = @transform_1, window_bounds = array<i64: 8, 3>}, {transform_indices = @transform_2, window_bounds = array<i64: 8, 768>}, {pipeline_mode = #tpu.pipeline_mode<synchronous>, transform_indices = @transform_3, window_bounds = array<i64: 1, 768>}, {pipeline_mode = #tpu.pipeline_mode<synchronous>, transform_indices = @transform_4, window_bounds = array<i64: 1, 768>}, {pipeline_mode = #tpu.pipeline_mode<synchronous>, transform_indices = @transform_5, window_bounds = array<i64: 16, 128>}, {transform_indices = @transform_6, window_bounds = array<i64: 1, 8, 128>}]} {
    %c0_i32 = arith.constant 0 : i32
    %0 = arith.cmpi eq, %arg1, %c0_i32 : i32
    %1 = arith.extui %0 : i1 to i32
    %c0_i32_0 = arith.constant 0 : i32
    %2 = arith.cmpi ne, %1, %c0_i32_0 : i32
    scf.if %2 {
      %cst_71 = arith.constant 0.000000e+00 : f32
      %216 = vector.broadcast %cst_71 : f32 to vector<8x128xf32>
      %c0_72 = arith.constant 0 : index
      %c0_73 = arith.constant 0 : index
      %217 = vector.load %arg9[%c0_72, %c0_73] : memref<8x128xf32, #tpu.memory_space<vmem>>, vector<8x128xf32>
      tpu.vector_store %arg9[%c0_72, %c0_73], %216 {strides = array<i32>} : memref<8x128xf32, #tpu.memory_space<vmem>>, vector<8x128xf32>,
      %c0_74 = arith.constant 0 : index
      %c0_75 = arith.constant 0 : index
      %218 = vector.load %arg7[%c0_74, %c0_75] : memref<16x128xbf16, #tpu.memory_space<vmem>>, vector<16x128xbf16>
      %219 = arith.extf %218 : vector<16x128xbf16> to vector<16x128xf32>
      %c0_76 = arith.constant 0 : index
      %c0_77 = arith.constant 0 : index
      %220 = vector.load %arg10[%c0_76, %c0_77] : memref<16x128xf32, #tpu.memory_space<vmem>>, vector<16x128xf32>
      tpu.vector_store %arg10[%c0_76, %c0_77], %219 {strides = array<i32>} : memref<16x128xf32, #tpu.memory_space<vmem>>, vector<16x128xf32>,
    } else {
    }
    %c0 = arith.constant 0 : index
    %c0_1 = arith.constant 0 : index
    %3 = vector.load %arg3[%c0, %c0_1] : memref<8x3xf32, #tpu.memory_space<vmem>>, vector<8x3xf32>
    %4 = tpu.iota {dimensions = array<i32: 1>} : vector<8x3xi32>
    %c0_i32_2 = arith.constant 0 : i32
    %5 = vector.broadcast %c0_i32_2 : i32 to vector<8x3xi32>
    %6 = arith.cmpi eq, %4, %5 : vector<8x3xi32>
    %cst = arith.constant 0.000000e+00 : f32
    %7 = vector.broadcast %cst : f32 to vector<8x3xf32>
    %8 = arith.select %6, %3, %7 : vector<8x3xi1>, vector<8x3xf32>
    %cst_3 = arith.constant dense<0.000000e+00> : vector<8xf32>
    %9 = vector.multi_reduction <add>, %8, %cst_3 [1] : vector<8x3xf32> to vector<8xf32>
    %10 = vector.shape_cast %9 : vector<8xf32> to vector<8x1xf32>
    %11 = arith.fptosi %10 : vector<8x1xf32> to vector<8x1xi32>
    %c1_i32 = arith.constant 1 : i32
    %12 = vector.broadcast %c1_i32 : i32 to vector<8x3xi32>
    %13 = arith.cmpi eq, %4, %12 : vector<8x3xi32>
    %cst_4 = arith.constant 0.000000e+00 : f32
    %14 = vector.broadcast %cst_4 : f32 to vector<8x3xf32>
    %15 = arith.select %13, %3, %14 : vector<8x3xi1>, vector<8x3xf32>
    %cst_5 = arith.constant dense<0.000000e+00> : vector<8xf32>
    %16 = vector.multi_reduction <add>, %15, %cst_5 [1] : vector<8x3xf32> to vector<8xf32>
    %17 = vector.shape_cast %16 : vector<8xf32> to vector<8x1xf32>
    %c2_i32 = arith.constant 2 : i32
    %18 = vector.broadcast %c2_i32 : i32 to vector<8x3xi32>
    %19 = arith.cmpi eq, %4, %18 : vector<8x3xi32>
    %cst_6 = arith.constant 0.000000e+00 : f32
    %20 = vector.broadcast %cst_6 : f32 to vector<8x3xf32>
    %21 = arith.select %19, %3, %20 : vector<8x3xi1>, vector<8x3xf32>
    %cst_7 = arith.constant dense<0.000000e+00> : vector<8xf32>
    %22 = vector.multi_reduction <add>, %21, %cst_7 [1] : vector<8x3xf32> to vector<8xf32>
    %23 = vector.shape_cast %22 : vector<8xf32> to vector<8x1xf32>
    %24 = arith.fptosi %23 : vector<8x1xf32> to vector<8x1xi32>
    %c0_8 = arith.constant 0 : index
    %c0_9 = arith.constant 0 : index
    %25 = vector.load %arg2[%c0_8, %c0_9] : memref<8x16xf32, #tpu.memory_space<vmem>>, vector<8x16xf32>
    %c0_10 = arith.constant 0 : index
    %c0_11 = arith.constant 0 : index
    %26 = vector.load %arg4[%c0_10, %c0_11] : memref<8x768xf32, #tpu.memory_space<vmem>>, vector<8x768xf32>
    %27 = tpu.iota {dimensions = array<i32: 1>} : vector<8x16xi32>
    %cst_12 = arith.constant dense<0xFF800000> : vector<8xf32>
    %28 = vector.multi_reduction <maximumf>, %25, %cst_12 [1] : vector<8x16xf32> to vector<8xf32>
    %29 = vector.shape_cast %28 : vector<8xf32> to vector<8x1xf32>
    %30 = vector.broadcast %29 : vector<8x1xf32> to vector<8x16xf32>
    %31 = arith.subf %25, %30 : vector<8x16xf32>
    %32 = math.exp %31 : vector<8x16xf32>
    %cst_13 = arith.constant dense<0.000000e+00> : vector<8xf32>
    %33 = vector.multi_reduction <add>, %32, %cst_13 [1] : vector<8x16xf32> to vector<8xf32>
    %34 = vector.shape_cast %33 : vector<8xf32> to vector<8x1xf32>
    %35 = math.log %34 : vector<8x1xf32>
    %36 = arith.addf %29, %35 : vector<8x1xf32>
    %37 = vector.broadcast %11 : vector<8x1xi32> to vector<8x16xi32>
    %38 = arith.cmpi eq, %27, %37 : vector<8x16xi32>
    %cst_14 = arith.constant 0.000000e+00 : f32
    %39 = vector.broadcast %cst_14 : f32 to vector<8x16xf32>
    %40 = arith.select %38, %25, %39 : vector<8x16xi1>, vector<8x16xf32>
    %cst_15 = arith.constant dense<0.000000e+00> : vector<8xf32>
    %41 = vector.multi_reduction <add>, %40, %cst_15 [1] : vector<8x16xf32> to vector<8xf32>
    %42 = vector.shape_cast %41 : vector<8xf32> to vector<8x1xf32>
    %43 = arith.subf %36, %42 : vector<8x1xf32>
    %cst_16 = arith.constant 1.000000e+00 : f32
    %44 = vector.broadcast %cst_16 : f32 to vector<8x1xf32>
    %45 = arith.subf %44, %17 : vector<8x1xf32>
    %cst_17 = arith.constant 1.000000e+00 : f32
    %46 = vector.broadcast %cst_17 : f32 to vector<8x1xf32>
    %47 = arith.mulf %45, %46 : vector<8x1xf32>
    %cst_18 = arith.constant 1.000000e+00 : f32
    %48 = vector.broadcast %cst_18 : f32 to vector<8x1xf32>
    %49 = arith.addf %48, %47 : vector<8x1xf32>
    %50 = arith.mulf %43, %49 : vector<8x1xf32>
    %cst_19 = arith.constant dense<0.000000e+00> : vector<8xf32>
    %51 = vector.multi_reduction <add>, %25, %cst_19 [1] : vector<8x16xf32> to vector<8xf32>
    %52 = vector.shape_cast %51 : vector<8xf32> to vector<8x1xf32>
    %cst_20 = arith.constant 1.600000e+01 : f32
    %53 = vector.broadcast %cst_20 : f32 to vector<8x1xf32>
    %54 = arith.divf %52, %53 : vector<8x1xf32>
    %c0_21 = arith.constant 0 : index
    %c0_22 = arith.constant 0 : index
    %55 = vector.load %arg5[%c0_21, %c0_22] : memref<1x768xf32, #tpu.memory_space<vmem>>, vector<1x768xf32>
    %c0_23 = arith.constant 0 : index
    %c0_24 = arith.constant 0 : index
    %56 = vector.load %arg6[%c0_23, %c0_24] : memref<1x768xf32, #tpu.memory_space<vmem>>, vector<1x768xf32>
    %57 = vector.broadcast %55 : vector<1x768xf32> to vector<8x768xf32>
    %58 = arith.mulf %26, %57 : vector<8x768xf32>
    %cst_25 = arith.constant dense<0.000000e+00> : vector<8xf32>
    %59 = vector.multi_reduction <add>, %58, %cst_25 [1] : vector<8x768xf32> to vector<8xf32>
    %60 = vector.shape_cast %59 : vector<8xf32> to vector<8x1xf32>
    %61 = vector.broadcast %56 : vector<1x768xf32> to vector<8x768xf32>
    %62 = arith.mulf %26, %61 : vector<8x768xf32>
    %cst_26 = arith.constant dense<0.000000e+00> : vector<8xf32>
    %63 = vector.multi_reduction <add>, %62, %cst_26 [1] : vector<8x768xf32> to vector<8xf32>
    %64 = vector.shape_cast %63 : vector<8xf32> to vector<8x1xf32>
    %65 = arith.mulf %26, %26 : vector<8x768xf32>
    %cst_27 = arith.constant dense<0.000000e+00> : vector<8xf32>
    %66 = vector.multi_reduction <add>, %65, %cst_27 [1] : vector<8x768xf32> to vector<8xf32>
    %67 = vector.shape_cast %66 : vector<8xf32> to vector<8x1xf32>
    %68 = arith.mulf %55, %55 : vector<1x768xf32>
    %69 = vector.shape_cast %68 : vector<1x768xf32> to vector<1x1x768xf32>
    %cst_28 = arith.constant dense<0.000000e+00> : vector<1xf32>
    %70 = vector.multi_reduction <add>, %69, %cst_28 [1, 2] : vector<1x1x768xf32> to vector<1xf32>
    %71 = vector.shape_cast %70 : vector<1xf32> to vector<1x1x1xf32>
    %72 = vector.extract %71[0, 0, 0] : f32 from vector<1x1x1xf32>
    %73 = arith.mulf %55, %56 : vector<1x768xf32>
    %74 = vector.shape_cast %73 : vector<1x768xf32> to vector<1x1x768xf32>
    %cst_29 = arith.constant dense<0.000000e+00> : vector<1xf32>
    %75 = vector.multi_reduction <add>, %74, %cst_29 [1, 2] : vector<1x1x768xf32> to vector<1xf32>
    %76 = vector.shape_cast %75 : vector<1xf32> to vector<1x1x1xf32>
    %77 = vector.extract %76[0, 0, 0] : f32 from vector<1x1x1xf32>
    %78 = arith.mulf %56, %56 : vector<1x768xf32>
    %79 = vector.shape_cast %78 : vector<1x768xf32> to vector<1x1x768xf32>
    %cst_30 = arith.constant dense<0.000000e+00> : vector<1xf32>
    %80 = vector.multi_reduction <add>, %79, %cst_30 [1, 2] : vector<1x1x768xf32> to vector<1xf32>
    %81 = vector.shape_cast %80 : vector<1xf32> to vector<1x1x1xf32>
    %82 = vector.extract %81[0, 0, 0] : f32 from vector<1x1x1xf32>
    %83 = arith.mulf %54, %54 : vector<8x1xf32>
    %84 = vector.broadcast %72 : f32 to vector<8x1xf32>
    %85 = arith.mulf %83, %84 : vector<8x1xf32>
    %cst_31 = arith.constant 2.000000e+00 : f32
    %86 = vector.broadcast %cst_31 : f32 to vector<8x1xf32>
    %87 = arith.mulf %86, %54 : vector<8x1xf32>
    %88 = vector.broadcast %77 : f32 to vector<8x1xf32>
    %89 = arith.mulf %87, %88 : vector<8x1xf32>
    %90 = arith.addf %85, %89 : vector<8x1xf32>
    %91 = vector.broadcast %82 : f32 to vector<8x1xf32>
    %92 = arith.addf %90, %91 : vector<8x1xf32>
    %cst_32 = arith.constant 0.000000e+00 : f32
    %93 = vector.broadcast %cst_32 : f32 to vector<8x1xf32>
    %94 = arith.maximumf %92, %93 : vector<8x1xf32>
    %95 = math.sqrt %94 : vector<8x1xf32>
    %96 = math.sqrt %67 : vector<8x1xf32>
    %97 = arith.mulf %54, %60 : vector<8x1xf32>
    %98 = arith.addf %97, %64 : vector<8x1xf32>
    %cst_33 = arith.constant 9.99999996E-13 : f32
    %99 = vector.broadcast %cst_33 : f32 to vector<8x1xf32>
    %100 = arith.maximumf %95, %99 : vector<8x1xf32>
    %cst_34 = arith.constant 9.99999996E-13 : f32
    %101 = vector.broadcast %cst_34 : f32 to vector<8x1xf32>
    %102 = arith.maximumf %96, %101 : vector<8x1xf32>
    %103 = arith.mulf %100, %102 : vector<8x1xf32>
    %104 = arith.divf %98, %103 : vector<8x1xf32>
    %105 = tpu.bitcast %25 : vector<8x16xf32> -> vector<8x16xi32>
    %c0_i32_35 = arith.constant 0 : i32
    %106 = vector.broadcast %c0_i32_35 : i32 to vector<8x16xi32>
    %107 = arith.cmpi slt, %105, %106 : vector<8x16xi32>
    %c-2147483648_i32 = arith.constant -2147483648 : i32
    %108 = vector.broadcast %c-2147483648_i32 : i32 to vector<8x16xi32>
    %109 = arith.subi %108, %105 : vector<8x16xi32>
    %110 = arith.select %107, %109, %105 : vector<8x16xi1>, vector<8x16xi32>
    %c-16_i32 = arith.constant -16 : i32
    %111 = vector.broadcast %c-16_i32 : i32 to vector<8x16xi32>
    %112 = arith.andi %110, %111 : vector<8x16xi32>
    %c15_i32 = arith.constant 15 : i32
    %113 = vector.broadcast %c15_i32 : i32 to vector<8x16xi32>
    %114 = arith.subi %113, %27 : vector<8x16xi32>
    %115 = arith.ori %112, %114 : vector<8x16xi32>
    %cst_36 = arith.constant dense<-2147483648> : vector<8xi32>
    %116 = vector.multi_reduction <maxsi>, %115, %cst_36 [1] : vector<8x16xi32> to vector<8xi32>
    %117 = vector.shape_cast %116 : vector<8xi32> to vector<8x1xi32>
    %118 = vector.broadcast %117 : vector<8x1xi32> to vector<8x16xi32>
    %119 = arith.cmpi slt, %115, %118 : vector<8x16xi32>
    %c-2147483648_i32_37 = arith.constant -2147483648 : i32
    %120 = vector.broadcast %c-2147483648_i32_37 : i32 to vector<8x16xi32>
    %121 = arith.select %119, %115, %120 : vector<8x16xi1>, vector<8x16xi32>
    %cst_38 = arith.constant dense<-2147483648> : vector<8xi32>
    %122 = vector.multi_reduction <maxsi>, %121, %cst_38 [1] : vector<8x16xi32> to vector<8xi32>
    %123 = vector.shape_cast %122 : vector<8xi32> to vector<8x1xi32>
    %124 = vector.broadcast %123 : vector<8x1xi32> to vector<8x16xi32>
    %125 = arith.cmpi slt, %115, %124 : vector<8x16xi32>
    %c-2147483648_i32_39 = arith.constant -2147483648 : i32
    %126 = vector.broadcast %c-2147483648_i32_39 : i32 to vector<8x16xi32>
    %127 = arith.select %125, %115, %126 : vector<8x16xi1>, vector<8x16xi32>
    %cst_40 = arith.constant dense<-2147483648> : vector<8xi32>
    %128 = vector.multi_reduction <maxsi>, %127, %cst_40 [1] : vector<8x16xi32> to vector<8xi32>
    %129 = vector.shape_cast %128 : vector<8xi32> to vector<8x1xi32>
    %130 = vector.broadcast %129 : vector<8x1xi32> to vector<8x16xi32>
    %131 = arith.cmpi slt, %115, %130 : vector<8x16xi32>
    %c-2147483648_i32_41 = arith.constant -2147483648 : i32
    %132 = vector.broadcast %c-2147483648_i32_41 : i32 to vector<8x16xi32>
    %133 = arith.select %131, %115, %132 : vector<8x16xi1>, vector<8x16xi32>
    %cst_42 = arith.constant dense<-2147483648> : vector<8xi32>
    %134 = vector.multi_reduction <maxsi>, %133, %cst_42 [1] : vector<8x16xi32> to vector<8xi32>
    %135 = vector.shape_cast %134 : vector<8xi32> to vector<8x1xi32>
    %136 = vector.broadcast %135 : vector<8x1xi32> to vector<8x16xi32>
    %137 = arith.cmpi slt, %115, %136 : vector<8x16xi32>
    %c-2147483648_i32_43 = arith.constant -2147483648 : i32
    %138 = vector.broadcast %c-2147483648_i32_43 : i32 to vector<8x16xi32>
    %139 = arith.select %137, %115, %138 : vector<8x16xi1>, vector<8x16xi32>
    %cst_44 = arith.constant dense<-2147483648> : vector<8xi32>
    %140 = vector.multi_reduction <maxsi>, %139, %cst_44 [1] : vector<8x16xi32> to vector<8xi32>
    %141 = vector.shape_cast %140 : vector<8xi32> to vector<8x1xi32>
    %142 = vector.broadcast %141 : vector<8x1xi32> to vector<8x16xi32>
    %143 = arith.cmpi sge, %115, %142 : vector<8x16xi32>
    %144 = arith.extui %143 : vector<8x16xi1> to vector<8x16xi32>
    %145 = arith.sitofp %144 : vector<8x16xi32> to vector<8x16xf32>
    %146 = arith.mulf %25, %145 : vector<8x16xf32>
    %c0_45 = arith.constant 0 : index
    %c0_46 = arith.constant 0 : index
    %147 = vector.load %arg10[%c0_45, %c0_46] : memref<16x128xf32, #tpu.memory_space<vmem>>, vector<16x128xf32>
    %cst_47 = arith.constant dense<0.000000e+00> : vector<8x128xf32>
    %148 = tpu.matmul %146, %147, %cst_47 {dimension_numbers = #tpu.dot_dimension_numbers<[1], [0], [0], [1], [0, 0, 1, 1], [], []>} : vector<8x16xf32>, vector<16x128xf32>, vector<8x128xf32> -> vector<8x128xf32>
    %149 = tpu.iota {dimensions = array<i32: 1>} : vector<8x128xi32>
    %c3_i32 = arith.constant 3 : i32
    %150 = vector.broadcast %c3_i32 : i32 to vector<8x128xi32>
    %151 = arith.cmpi slt, %149, %150 : vector<8x128xi32>
    %cst_48 = arith.constant -1.000000e+30 : f32
    %152 = vector.broadcast %cst_48 : f32 to vector<8x128xf32>
    %153 = arith.select %151, %148, %152 : vector<8x128xi1>, vector<8x128xf32>
    %cst_49 = arith.constant dense<0xFF800000> : vector<8xf32>
    %154 = vector.multi_reduction <maximumf>, %153, %cst_49 [1] : vector<8x128xf32> to vector<8xf32>
    %155 = vector.shape_cast %154 : vector<8xf32> to vector<8x1xf32>
    %156 = vector.broadcast %155 : vector<8x1xf32> to vector<8x128xf32>
    %157 = arith.subf %153, %156 : vector<8x128xf32>
    %158 = math.exp %157 : vector<8x128xf32>
    %cst_50 = arith.constant dense<0.000000e+00> : vector<8xf32>
    %159 = vector.multi_reduction <add>, %158, %cst_50 [1] : vector<8x128xf32> to vector<8xf32>
    %160 = vector.shape_cast %159 : vector<8xf32> to vector<8x1xf32>
    %161 = math.log %160 : vector<8x1xf32>
    %162 = arith.addf %155, %161 : vector<8x1xf32>
    %163 = vector.broadcast %24 : vector<8x1xi32> to vector<8x128xi32>
    %164 = arith.cmpi eq, %149, %163 : vector<8x128xi32>
    %cst_51 = arith.constant 0.000000e+00 : f32
    %165 = vector.broadcast %cst_51 : f32 to vector<8x128xf32>
    %166 = arith.select %164, %153, %165 : vector<8x128xi1>, vector<8x128xf32>
    %cst_52 = arith.constant dense<0.000000e+00> : vector<8xf32>
    %167 = vector.multi_reduction <add>, %166, %cst_52 [1] : vector<8x128xf32> to vector<8xf32>
    %168 = vector.shape_cast %167 : vector<8xf32> to vector<8x1xf32>
    %169 = arith.subf %162, %168 : vector<8x1xf32>
    %170 = vector.shape_cast %43 : vector<8x1xf32> to vector<1x8x1xf32>
    %cst_53 = arith.constant dense<0.000000e+00> : vector<1xf32>
    %171 = vector.multi_reduction <add>, %170, %cst_53 [1, 2] : vector<1x8x1xf32> to vector<1xf32>
    %172 = vector.shape_cast %171 : vector<1xf32> to vector<1x1x1xf32>
    %173 = vector.extract %172[0, 0, 0] : f32 from vector<1x1x1xf32>
    %174 = vector.shape_cast %50 : vector<8x1xf32> to vector<1x8x1xf32>
    %cst_54 = arith.constant dense<0.000000e+00> : vector<1xf32>
    %175 = vector.multi_reduction <add>, %174, %cst_54 [1, 2] : vector<1x8x1xf32> to vector<1xf32>
    %176 = vector.shape_cast %175 : vector<1xf32> to vector<1x1x1xf32>
    %177 = vector.extract %176[0, 0, 0] : f32 from vector<1x1x1xf32>
    %178 = vector.shape_cast %104 : vector<8x1xf32> to vector<1x8x1xf32>
    %cst_55 = arith.constant dense<0.000000e+00> : vector<1xf32>
    %179 = vector.multi_reduction <add>, %178, %cst_55 [1, 2] : vector<1x8x1xf32> to vector<1xf32>
    %180 = vector.shape_cast %179 : vector<1xf32> to vector<1x1x1xf32>
    %181 = vector.extract %180[0, 0, 0] : f32 from vector<1x1x1xf32>
    %182 = vector.shape_cast %169 : vector<8x1xf32> to vector<1x8x1xf32>
    %cst_56 = arith.constant dense<0.000000e+00> : vector<1xf32>
    %183 = vector.multi_reduction <add>, %182, %cst_56 [1, 2] : vector<1x8x1xf32> to vector<1xf32>
    %184 = vector.shape_cast %183 : vector<1xf32> to vector<1x1x1xf32>
    %185 = vector.extract %184[0, 0, 0] : f32 from vector<1x1x1xf32>
    %186 = tpu.iota {dimensions = array<i32: 1>} : vector<8x128xi32>
    %c0_57 = arith.constant 0 : index
    %c0_58 = arith.constant 0 : index
    %187 = vector.load %arg9[%c0_57, %c0_58] : memref<8x128xf32, #tpu.memory_space<vmem>>, vector<8x128xf32>
    %c0_i32_59 = arith.constant 0 : i32
    %188 = vector.broadcast %c0_i32_59 : i32 to vector<8x128xi32>
    %189 = arith.cmpi eq, %186, %188 : vector<8x128xi32>
    %cst_60 = arith.constant 0.000000e+00 : f32
    %190 = vector.broadcast %173 : f32 to vector<8x128xf32>
    %191 = vector.broadcast %cst_60 : f32 to vector<8x128xf32>
    %192 = arith.select %189, %190, %191 : vector<8x128xi1>, vector<8x128xf32>
    %c1_i32_61 = arith.constant 1 : i32
    %193 = vector.broadcast %c1_i32_61 : i32 to vector<8x128xi32>
    %194 = arith.cmpi eq, %186, %193 : vector<8x128xi32>
    %cst_62 = arith.constant 0.000000e+00 : f32
    %195 = vector.broadcast %177 : f32 to vector<8x128xf32>
    %196 = vector.broadcast %cst_62 : f32 to vector<8x128xf32>
    %197 = arith.select %194, %195, %196 : vector<8x128xi1>, vector<8x128xf32>
    %198 = arith.addf %192, %197 : vector<8x128xf32>
    %c2_i32_63 = arith.constant 2 : i32
    %199 = vector.broadcast %c2_i32_63 : i32 to vector<8x128xi32>
    %200 = arith.cmpi eq, %186, %199 : vector<8x128xi32>
    %cst_64 = arith.constant 0.000000e+00 : f32
    %201 = vector.broadcast %181 : f32 to vector<8x128xf32>
    %202 = vector.broadcast %cst_64 : f32 to vector<8x128xf32>
    %203 = arith.select %200, %201, %202 : vector<8x128xi1>, vector<8x128xf32>
    %204 = arith.addf %198, %203 : vector<8x128xf32>
    %c3_i32_65 = arith.constant 3 : i32
    %205 = vector.broadcast %c3_i32_65 : i32 to vector<8x128xi32>
    %206 = arith.cmpi eq, %186, %205 : vector<8x128xi32>
    %cst_66 = arith.constant 0.000000e+00 : f32
    %207 = vector.broadcast %185 : f32 to vector<8x128xf32>
    %208 = vector.broadcast %cst_66 : f32 to vector<8x128xf32>
    %209 = arith.select %206, %207, %208 : vector<8x128xi1>, vector<8x128xf32>
    %210 = arith.addf %204, %209 : vector<8x128xf32>
    %211 = arith.addf %187, %210 : vector<8x128xf32>
    %c0_67 = arith.constant 0 : index
    %c0_68 = arith.constant 0 : index
    %212 = vector.load %arg9[%c0_67, %c0_68] : memref<8x128xf32, #tpu.memory_space<vmem>>, vector<8x128xf32>
    tpu.vector_store %arg9[%c0_67, %c0_68], %211 {strides = array<i32>} : memref<8x128xf32, #tpu.memory_space<vmem>>, vector<8x128xf32>,
    %c0_i32_69 = arith.constant 0 : i32
    %213 = arith.cmpi eq, %arg1, %c0_i32_69 : i32
    %214 = arith.extui %213 : i1 to i32
    %c0_i32_70 = arith.constant 0 : i32
    %215 = arith.cmpi ne, %214, %c0_i32_70 : i32
    scf.if %215 {
      %c0_71 = arith.constant 0 : index
      %c0_72 = arith.constant 0 : index
      %216 = vector.load %arg9[%c0_71, %c0_72] : memref<8x128xf32, #tpu.memory_space<vmem>>, vector<8x128xf32>
      %c0_73 = arith.constant 0 : index
      %c0_74 = arith.constant 0 : index
      %c0_75 = arith.constant 0 : index
      %217 = vector.load %arg8[%c0_73, %c0_74, %c0_75] : memref<1x8x128xf32, #tpu.memory_space<vmem>>, vector<1x8x128xf32>
      %218 = vector.shape_cast %217 : vector<1x8x128xf32> to vector<8x128xf32>
      %219 = vector.shape_cast %216 : vector<8x128xf32> to vector<1x8x128xf32>
      tpu.vector_store %arg8[%c0_73, %c0_74, %c0_75], %219 {strides = array<i32>} : memref<1x8x128xf32, #tpu.memory_space<vmem>>, vector<1x8x128xf32>,
    } else {
    }
    return
  }
  func.func @transform_0(%arg0: i32, %arg1: i32) -> (i32, i32) {
    %c1_i32 = arith.constant 1 : i32
    %0 = arith.muli %arg0, %c1_i32 : i32
    %1 = arith.addi %0, %arg1 : i32
    %c0_i32 = arith.constant 0 : i32
    %2 = arith.minsi %1, %c0_i32 : i32
    %c0_i32_0 = arith.constant 0 : i32
    %c0_i32_1 = arith.constant 0 : i32
    return %2, %c0_i32_0 : i32, i32
  }
  func.func @transform_1(%arg0: i32, %arg1: i32) -> (i32, i32) {
    %c1_i32 = arith.constant 1 : i32
    %0 = arith.muli %arg0, %c1_i32 : i32
    %1 = arith.addi %0, %arg1 : i32
    %c0_i32 = arith.constant 0 : i32
    %2 = arith.minsi %1, %c0_i32 : i32
    %c0_i32_0 = arith.constant 0 : i32
    %c0_i32_1 = arith.constant 0 : i32
    return %2, %c0_i32_0 : i32, i32
  }
  func.func @transform_2(%arg0: i32, %arg1: i32) -> (i32, i32) {
    %c1_i32 = arith.constant 1 : i32
    %0 = arith.muli %arg0, %c1_i32 : i32
    %1 = arith.addi %0, %arg1 : i32
    %c0_i32 = arith.constant 0 : i32
    %2 = arith.minsi %1, %c0_i32 : i32
    %c0_i32_0 = arith.constant 0 : i32
    %c0_i32_1 = arith.constant 0 : i32
    return %2, %c0_i32_0 : i32, i32
  }
  func.func @transform_3(%arg0: i32, %arg1: i32) -> (i32, i32) {
    %c0_i32 = arith.constant 0 : i32
    %c0_i32_0 = arith.constant 0 : i32
    %c0_i32_1 = arith.constant 0 : i32
    return %c0_i32, %c0_i32_0 : i32, i32
  }
  func.func @transform_4(%arg0: i32, %arg1: i32) -> (i32, i32) {
    %c0_i32 = arith.constant 0 : i32
    %c0_i32_0 = arith.constant 0 : i32
    %c0_i32_1 = arith.constant 0 : i32
    return %c0_i32, %c0_i32_0 : i32, i32
  }
  func.func @transform_5(%arg0: i32, %arg1: i32) -> (i32, i32) {
    %c0_i32 = arith.constant 0 : i32
    %c0_i32_0 = arith.constant 0 : i32
    %c0_i32_1 = arith.constant 0 : i32
    return %c0_i32, %c0_i32_0 : i32, i32
  }
  func.func @transform_6(%arg0: i32, %arg1: i32) -> (i32, i32, i32) {
    %c0_i32 = arith.constant 0 : i32
    %c0_i32_0 = arith.constant 0 : i32
    %c0_i32_1 = arith.constant 0 : i32
    return %arg0, %c0_i32, %c0_i32_0 : i32, i32, i32
  }
}

</mosaic_0001>

<bundles_post_ra>
// kernel: automotive_loss.1
= control target key start
LH: loop header
LB: loop body
LE: loop exit
PB: predicated region body
PF: predicated region fallthrough
CT: control target
= control target key end

     0   :  { %11 = vsyncpa [#allocation5], 0  ;;  %s819_s21 = smov [#allocation4]   ;;  %s1095_s0 = inlined_call_operand.vmem [shape: f32[8,16], index: 0, kind: input, shape index: {}]   ;;  %s1096_s1 = inlined_call_operand.vmem [shape: f32[8,3], index: 1, kind: input, shape index: {}]   ;;  %s1097_s2 = inlined_call_operand.vmem [shape: f32[8,768], index: 2, kind: input, shape index: {}]   ;;  %s1098_s3 = inlined_call_operand.vmem [shape: f32[1,768], index: 3, kind: input, shape index: {}]   ;;  %s1099_s4 = inlined_call_operand.hbm [shape: f32[1,768], index: 4, kind: input, shape index: {}]   ;;  %s1100_s5 = inlined_call_operand.vmem [shape: bf16[16,128], index: 5, kind: input, shape index: {}]   ;;  %s1101_s6 = inlined_call_operand.vmem [shape: f32[1,8,128], index: 6, kind: output, shape index: {}]  }
   0x1   :  { %s57_s22 = sshll.u32 %s819_s21, 4  ;;  %s58_s22 = int_to_ptr.vmem [resolvable:$true] %s57_s22 }
   0x2   :  { %s805_s23 = scalar_lea.vmem %s58_s22, 96  ;;  %p810_p1 = scmp.lt.s32.totalorder %s58_s22, %s58_s22 }
   0x3   :  { %p806_p0 = scmp.ne.s32.totalorder %s58_s22, %s805_s23  ;;  %p811_p2 = scmp.lt.s32.totalorder %s805_s23, %s805_s23 }
   0x5   :  { %p812_p3 = por %p811_p2, %p810_p1 }
   0x7   :  { %p813_p4 = pnand %p812_p3, %p806_p0 }
   0x9   :  { %816 = shalt.err (!%p813_p4)
}
   0xa   :  { %60 = dma.hbm_to_vmem [thread:$0]  %s1099_s4, 96, %s58_s22, [#allocation5]  }
   0xb   :  { %817 = dma.done.wait [#allocation5], 96  }
   0xc   :  { %818 = vsyncadd [#allocation5], 4294967200  ;;  %v131_v0 = vlaneseq  ;;  %v866_v2 = vld [vmem:[%s1095_s0] sm:$0xff]  ;;  %vm158_vm1 = vcmask 130048   ;;  %vm821_vm11 = vmmov 0   ;;  %vm320_vm12 = vcmask 1040384  }
   0xd   :  { %vm477_vm0 = vcmp.lt.s32.totalorder %v866_v2, 0  ;;  %v478_v3 = vsub.s32 2147483648, %v866_v2  ;;  %vm135_vm14 = vcmask 23552  }
   0xe   :  { %v861_v1 = vand.u32 127, %v131_v0 }
   0xf   :  { %v479_v5 = vsel %vm477_vm0, %v478_v3, %v866_v2 }
  0x10   :  { %v481_v4 = vsub.s32 15, %v861_v1  ;;  %v480_v6 = vand.u32 4294967280, %v479_v5  ;;  %vm145_vm13 = vcmp.eq.s32.totalorder %v861_v1, 2  ;;  %vm133_vm0 = vcmp.eq.s32.totalorder %v861_v1, 0 }
  0x12   :  { %v872_v7 = vor.u32 %v481_v4, %v480_v6  ;;  %v749_v6 = vld [vmem:[%s1100_s5] sm:$0xff]  }
  0x14   :  { %v483_v8 = vsel %vm158_vm1, %v872_v7, 2147483648 }
  0x15   :  { %v485_v9 = vshra.s32 %v483_v8, 16  ;;  %v484_v11 = vand.u32 65535, %v483_v8  ;;  %v751_v8 = vunpack.c.h.bf16 %v749_v6 }
  0x17   :  { %v487_v10 = vcvt.s32.f32 %v485_v9  ;;  %v486_v12 = vcvt.s32.f32 %v484_v11  ;;  %v820_v9 = vmov 0.0   ;;  %v159_v11 = vsel %vm158_vm1, %v866_v2, -inf }
  0x18   :  { %755 = vmatprep.subr.mxu0 %v820_v9  ;;  %759 = vmatprep.mubr.msk.f32.mxu0 %vm821_vm11, %v820_v9 }
  0x19   :  { %488 = vmax.xlane.f32.xlu0 %v487_v10  ;;  %756 = vmatpush3.msra.mxu0 %v751_v8  ;;  %v962_v8 = vld [vmem:[%s1096_s1] sm:$0xff] }
  0x1a   :  { %757 = vmatprep.subr.mxu0 %v820_v9 }
  0xa2   :  { %v489_v13 = vpop.xlane.xlu0 %488 }
  0xa3   :  { %vm490_vm2 = vcmp.eq.f32.partialorder %v487_v10, %v489_v13  ;;  %v495_v15 = vcvt.f32.s32 %v489_v13  ;;  %v750_v10 = vunpack.c.l.bf16 %v749_v6  ;;  %v904_v13 = vld [vmem:[#allocation4] sm:$0x3f] }
  0xa4   :  { %v491_v14 = vsel %vm490_vm2, %v486_v12, -inf  ;;  %v902_v12 = vld [vmem:[%s1098_s3] sm:$0x3f]  ;;  %vm645_vm2 = vcmp.lt.s32.totalorder %v861_v1, 3 }
  0xa5   :  { %492 = vmax.xlane.f32.xlu0 %v491_v14  ;;  %v496_v17 = vshll.u32 %v495_v15, 16  ;;  %758 = vmatpush3.msra.mxu0 %v750_v10  ;;  %v189_v14 = vshrl.u32 %v131_v0, 7  ;;  %v341_v15 = vmul.f32 %v904_v13, %v902_v12 }
 0x12e   :  { %v493_v16 = vpop.xlane.xlu0 %492 }
 0x12f   :  { %v494_v18 = vcvt.f32.s32 %v493_v16  ;;  %v393_v16 = vmul.f32 %v904_v13, %v904_v13 }
 0x131   :  { %v497_v19 = vadd.s32 %v496_v17, %v494_v18  ;;  %v911_v17 = vsub.s32 0, %v189_v14  ;;  %v913_v18 = vsub.s32 1, %v189_v14 }
 0x133   :  { %vm498_vm3 = vcmp.lt.s32.totalorder %v872_v7, %v497_v19  ;;  %v915_v19 = vsub.s32 2, %v189_v14  ;;  %v346_v0 = vrot.slane %v341_v15, %v911_v17 }
 0x134   :  { %v499_v20 = vsel %vm498_vm3, %v872_v7, 2147483648  ;;  %vm140_vm3 = vcmp.eq.s32.totalorder %v861_v1, 1 }
 0x135   :  { %v500_v21 = vsel %vm158_vm1, %v499_v20, 2147483648  ;;  %v917_v20 = vsub.s32 3, %v189_v14 }
 0x136   :  { %v502_v22 = vshra.s32 %v500_v21, 16  ;;  %v501_v24 = vand.u32 65535, %v500_v21  ;;  %v919_v21 = vsub.s32 4, %v189_v14 }
 0x138   :  { %v504_v23 = vcvt.s32.f32 %v502_v22  ;;  %v503_v26 = vcvt.s32.f32 %v501_v24  ;;  %v921_v22 = vsub.s32 5, %v189_v14  ;;  %v354_v24 = vrot.slane %v341_v15, %v915_v19 }
 0x13a   :  { %505 = vmax.xlane.f32.xlu1 %v504_v23 }
 0x1c3   :  { %v506_v25 = vpop.xlane.xlu1 %505 }
 0x1c4   :  { %vm507_vm4 = vcmp.eq.f32.partialorder %v504_v23, %v506_v25  ;;  %v512_v28 = vcvt.f32.s32 %v506_v25  ;;  %v350_v23 = vrot.slane %v341_v15, %v913_v18  ;;  %v358_v25 = vrot.slane %v341_v15, %v917_v20 }
 0x1c5   :  { %v508_v27 = vsel %vm507_vm4, %v503_v26, -inf  ;;  %v362_v26 = vrot.slane %v341_v15, %v919_v21 }
 0x1c6   :  { %509 = vmax.xlane.f32.xlu1 %v508_v27  ;;  %v513_v30 = vshll.u32 %v512_v28, 16  ;;  %v398_v27 = vrot.slane %v393_v16, %v911_v17  ;;  %v402_v28 = vrot.slane %v393_v16, %v913_v18 }
 0x24f   :  { %v510_v29 = vpop.xlane.xlu1 %509 }
 0x250   :  { %v511_v31 = vcvt.f32.s32 %v510_v29  ;;  %v366_v29 = vrot.slane %v341_v15, %v921_v22 }
 0x252   :  { %v514_v32 = vadd.s32 %v513_v30, %v511_v31  ;;  %v373_v30 = vsel %vm320_vm12, %v346_v0, 0.0  ;;  %v374_v31 = vsel %vm320_vm12, %v350_v23, 0.0 }
 0x254   :  { %vm515_vm5 = vcmp.lt.s32.totalorder %v872_v7, %v514_v32  ;;  %v376_v32 = vsel %vm320_vm12, %v354_v24, 0.0 }
 0x255   :  { %v516_v33 = vsel %vm515_vm5, %v872_v7, 2147483648 }
 0x256   :  { %v517_v34 = vsel %vm158_vm1, %v516_v33, 2147483648  ;;  %v375_v33 = vadd.f32 %v374_v31, %v373_v30 }
 0x257   :  { %v519_v35 = vshra.s32 %v517_v34, 16  ;;  %v518_v37 = vand.u32 65535, %v517_v34  ;;  %v406_v34 = vrot.slane %v393_v16, %v915_v19 }
 0x259   :  { %v521_v36 = vcvt.s32.f32 %v519_v35  ;;  %v520_v39 = vcvt.s32.f32 %v518_v37  ;;  %v288_v35 = vmul.f32 %v902_v12, %v902_v12  ;;  %v410_v37 = vrot.slane %v393_v16, %v917_v20 }
 0x25b   :  { %522 = vmax.xlane.f32.xlu0 %v521_v36 }
 0x2e4   :  { %v523_v38 = vpop.xlane.xlu0 %522 }
 0x2e5   :  { %vm524_vm6 = vcmp.eq.f32.partialorder %v521_v36, %v523_v38  ;;  %v529_v41 = vcvt.f32.s32 %v523_v38  ;;  %v378_v36 = vsel %vm320_vm12, %v358_v25, 0.0  ;;  %v414_v38 = vrot.slane %v393_v16, %v919_v21 }
 0x2e6   :  { %v525_v40 = vsel %vm524_vm6, %v520_v39, -inf  ;;  %v425_v39 = vsel %vm320_vm12, %v398_v27, 0.0 }
 0x2e7   :  { %526 = vmax.xlane.f32.xlu1 %v525_v40  ;;  %v530_v43 = vshll.u32 %v529_v41, 16  ;;  %v377_v40 = vadd.f32 %v376_v32, %v375_v33  ;;  %v426_v41 = vsel %vm320_vm12, %v402_v28, 0.0 }
 0x370   :  { %v527_v42 = vpop.xlane.xlu1 %526 }
 0x371   :  { %v528_v44 = vcvt.f32.s32 %v527_v42  ;;  %v428_v42 = vsel %vm320_vm12, %v406_v34, 0.0 }
 0x373   :  { %v531_v45 = vadd.s32 %v530_v43, %v528_v44  ;;  %v380_v43 = vsel %vm320_vm12, %v362_v26, 0.0  ;;  %v382_v44 = vsel %vm320_vm12, %v366_v29, 0.0 }
 0x375   :  { %vm532_vm7 = vcmp.lt.s32.totalorder %v872_v7, %v531_v45  ;;  %v418_v45 = vrot.slane %v393_v16, %v921_v22  ;;  %v146_v16 = vsel %vm145_vm13, %v962_v8, 0.0 }
 0x376   :  { %v533_v46 = vsel %vm532_vm7, %v872_v7, 2147483648  ;;  %v147_v24 = vsel %vm135_vm14, %v146_v16, 0.0  ;;  %v191_v16 = vrot.slane %v902_v12, %v911_v17 }
 0x377   :  { %v534_v47 = vsel %vm158_vm1, %v533_v46, 2147483648  ;;  %v427_v46 = vadd.f32 %v426_v41, %v425_v39  ;;  %v991_v41 = vld [vmem:[%s1097_s2 + $0x10] sm:$0xff] }
 0x378   :  { %v536_v48 = vshra.s32 %v534_v47, 16  ;;  %v535_v50 = vand.u32 65535, %v534_v47  ;;  %v379_v47 = vadd.f32 %v378_v36, %v377_v40 }
 0x37a   :  { %v538_v49 = vcvt.s32.f32 %v536_v48  ;;  %v537_v52 = vcvt.s32.f32 %v535_v50  ;;  %v430_v48 = vsel %vm320_vm12, %v410_v37, 0.0  ;;  %v297_v50 = vrot.slane %v288_v35, %v913_v18 }
 0x37c   :  { %539 = vmax.xlane.f32.xlu0 %v538_v49 }
 0x405   :  { %v540_v51 = vpop.xlane.xlu0 %539 }
 0x406   :  { %vm541_vm8 = vcmp.eq.f32.partialorder %v538_v49, %v540_v51  ;;  %v546_v54 = vcvt.f32.s32 %v540_v51  ;;  %v293_v49 = vrot.slane %v288_v35, %v911_v17  ;;  %v429_v51 = vadd.f32 %v428_v42, %v427_v46  ;;  %v1002_v46 = vld [vmem:[%s1097_s2 + $0x18] sm:$0xff] }
 0x407   :  { %v542_v53 = vsel %vm541_vm8, %v537_v52, -inf  ;;  %v432_v52 = vsel %vm320_vm12, %v414_v38, 0.0 }
 0x408   :  { %543 = vmax.xlane.f32.xlu1 %v542_v53  ;;  %v547_v56 = vshll.u32 %v546_v54, 16  ;;  %v301_v53 = vrot.slane %v288_v35, %v915_v19  ;;  %v305_v54 = vrot.slane %v288_v35, %v917_v20 }
 0x491   :  { %v544_v55 = vpop.xlane.xlu1 %543 }
 0x492   :  { %v545_v57 = vcvt.f32.s32 %v544_v55  ;;  %v381_v55 = vadd.f32 %v380_v43, %v379_v47 }
 0x494   :  { %v548_v58 = vadd.s32 %v547_v56, %v545_v57  ;;  %v309_v56 = vrot.slane %v288_v35, %v919_v21  ;;  %v321_v57 = vsel %vm320_vm12, %v293_v49, 0.0 }
 0x496   :  { %vm549_vm9 = vcmp.lt.s32.totalorder %v872_v7, %v548_v58  ;;  %v322_v58 = vsel %vm320_vm12, %v297_v50, 0.0 }
 0x497   :  { %v550_v59 = vsel %vm549_vm9, %v872_v7, 2147483648  ;;  %vm662_vm9 = vcmask 7168  }
 0x498   :  { %v551_v60 = vsel %vm158_vm1, %v550_v59, 2147483648  ;;  %v431_v59 = vadd.f32 %v430_v48, %v429_v51  ;;  %v278_v48 = vmul.f32 %v1002_v46, %v1002_v46  ;;  %v1009_v51 = vld [vmem:[%s1097_s2 + $0x20] sm:$0xff] }
 0x499   :  { %v553_v61 = vshra.s32 %v551_v60, 16  ;;  %v552_v63 = vand.u32 65535, %v551_v60  ;;  %v323_v60 = vadd.f32 %v322_v58, %v321_v57 }
 0x49a   :  { %v433_v6 = vadd.f32 %v432_v52, %v431_v59 }
 0x49b   :  { %v555_v62 = vcvt.s32.f32 %v553_v61  ;;  %v554_v4 = vcvt.s32.f32 %v552_v63  ;;  %v324_v61 = vsel %vm320_vm12, %v301_v53, 0.0  ;;  %v434_v63 = vsel %vm320_vm12, %v418_v45, 0.0 }
 0x49c   :  { %v325_v10 = vadd.f32 %v324_v61, %v323_v60  ;;  %v435_v14 = vadd.f32 %v434_v63, %v433_v6 }
 0x49d   :  { %556 = vmax.xlane.f32.xlu0 %v555_v62 }
 0x4a1   :  { %160 = vmax.xlane.f32.xlu0 %v159_v11  ;;  %v328_v11 = vsel %vm320_vm12, %v309_v56, 0.0  ;;  %v1016_v56 = vld [vmem:[%s1097_s2 + $0x28] sm:$0xff] }
 0x4a2   :  { %v280_v58 = vmul.f32 %v1016_v56, %v1016_v56 }
 0x526   :  { %v888_v3 = vpop.xlane.xlu0 %556 }
 0x527   :  { %vm558_vm10 = vcmp.eq.f32.partialorder %v555_v62, %v888_v3  ;;  %v383_v62 = vadd.f32 %v382_v44, %v381_v55  ;;  %v563_v26 = vcvt.f32.s32 %v888_v3  ;;  %v277_v44 = vmul.f32 %v991_v41, %v991_v41 }
 0x528   :  { %v559_v5 = vsel %vm558_vm10, %v554_v4, -inf  ;;  %v313_v4 = vrot.slane %v288_v35, %v921_v22  ;;  %vm712_vm10 = vcmp.eq.s32.totalorder %v861_v1, 3 }
 0x529   :  { %560 = vmax.xlane.f32.xlu1 %v559_v5  ;;  %v326_v5 = vsel %vm320_vm12, %v305_v54, 0.0  ;;  %384 = vadd.xlane.f32.xlu0 %v383_v62  ;;  %v564_v28 = vshll.u32 %v563_v26, 16  ;;  %v279_v54 = vmul.f32 %v1009_v51, %v1009_v51 }
 0x52a   :  { %v327_v15 = vadd.f32 %v326_v5, %v325_v10  ;;  %v330_v0 = vsel %vm320_vm12, %v313_v4, 0.0  ;;  %v976_v33 = vpop.xlane.xlu0 %160 }
 0x52c   :  { %v329_v23 = vadd.f32 %v328_v11, %v327_v15 }
 0x52d   :  { %436 = vadd.xlane.f32.xlu0 %v435_v14  ;;  %v162_v14 = vsub.f32 %v866_v2, %v976_v33 }
 0x52e   :  { %v331_v25 = vadd.f32 %v330_v0, %v329_v23  ;;  %v195_v0 = vrot.slane %v902_v12, %v913_v18  ;;  %v199_v23 = vrot.slane %v902_v12, %v915_v19 }
 0x52f   :  { %v163_v15 = vmul.f32 1.442695, %v162_v14 }
 0x530   :  { %332 = vadd.xlane.f32.xlu1 %v331_v25 }
 0x531   :  { %148 = vadd.xlane.f32.xlu0 %v147_v24  ;;  %783 = vpow2.f32 %v163_v15 }
 0x5b2   :  { %v561_v27 = vpop.xlane.xlu1 %560  ;;  %v385_v34 = vpop.xlane.xlu0 %384 }
 0x5b3   :  { %v562_v29 = vcvt.f32.s32 %v561_v27  ;;  %v386_v35 = vrot.slane %v385_v34, 4  ;;  %v134_v27 = vsel %vm133_vm0, %v962_v8, 0.0 }
 0x5b5   :  { %v565_v30 = vadd.s32 %v564_v28, %v562_v29  ;;  %v387_v38 = vadd.f32 %v386_v35, %v385_v34  ;;  %v136_v34 = vsel %vm135_vm14, %v134_v27, 0.0  ;;  %v207_v35 = vrot.slane %v902_v12, %v919_v21 }
 0x5b6   :  { %v437_v36 = vpop.xlane.xlu0 %436 }
 0x5b7   :  { %vm566_vm15 = vcmp.ge.s32.totalorder %v872_v7, %v565_v30  ;;  %v438_v37 = vrot.slane %v437_v36, 4  ;;  %v388_v39 = vrot.slane %v387_v38, 2  ;;  %v981_v7 = vld [vmem:[%s1097_s2] sm:$0xff]  ;;  %v203_v30 = vrot.slane %v902_v12, %v917_v20 }
 0x5b8   :  { %v746_v31 = vsel %vm566_vm15, 1.0, %v820_v9  ;;  %v986_v9 = vld [vmem:[%s1097_s2 + $0x8] sm:$0xff]  ;;  %v275_v42 = vmul.f32 %v981_v7, %v981_v7  ;;  %v218_v24 = vmul.f32 %v191_v16, %v981_v7 }
 0x5b9   :  { %v569_v32 = vmul.f32 %v746_v31, %v866_v2  ;;  %v439_v3 = vadd.f32 %v438_v37, %v437_v36  ;;  %v276_v43 = vmul.f32 %v986_v9, %v986_v9  ;;  %v333_v45 = vpop.xlane.xlu1 %332  ;;  %v389_v50 = vadd.f32 %v388_v39, %v387_v38 }
 0x5ba   :  { %v334_v47 = vrot.slane %v333_v45, 4  ;;  %v219_v25 = vmul.f32 %v195_v0, %v986_v9  ;;  %v220_v31 = vmul.f32 %v199_v23, %v991_v41  ;;  %v221_v36 = vmul.f32 %v203_v30, %v1002_v46 }
 0x5bb   :  { %760 = vmatmul.mubr.msk.f32.vlgmr.msra.gmra.mxu0 %vm158_vm1, %v569_v32  ;;  %v440_v40 = vrot.slane %v439_v3, 2  ;;  %v281_v49 = vadd.f32 %v276_v43, %v275_v42  ;;  %v390_v60 = vrot.slane %v389_v50, 1  ;;  %v180_v38 = vsel %vm158_vm1, %v866_v2, 0.0  ;;  %v149_v43 = vpop.xlane.xlu0 %148 }
 0x5bc   :  { %v335_v52 = vadd.f32 %v334_v47, %v333_v45  ;;  %v224_v32 = vadd.f32 %v219_v25, %v218_v24  ;;  %v211_v39 = vrot.slane %v902_v12, %v921_v22  ;;  %v141_v45 = vsel %vm140_vm3, %v962_v8, 0.0 }
 0x5bd   :  { %v441_v53 = vadd.f32 %v440_v40, %v439_v3  ;;  %v282_v55 = vadd.f32 %v281_v49, %v277_v44  ;;  %v391_v6 = vadd.f32 %v390_v60, %v389_v50  ;;  %v784_v3 = vpop.eup %783  ;;  %v222_v40 = vmul.f32 %v207_v35, %v1009_v51 }
 0x5be   :  { %v336_v57 = vrot.slane %v335_v52, 2  ;;  %v225_v37 = vadd.f32 %v224_v32, %v220_v31  ;;  %v165_v44 = vsel %vm158_vm1, %v784_v3, 0.0  ;;  %v764_v47 = vtrunc.f32 %v149_v43 }
 0x5bf   :  { %v283_v59 = vadd.f32 %v282_v55, %v278_v48  ;;  %v442_v62 = vrot.slane %v441_v53, 1  ;;  %v223_v48 = vmul.f32 %v211_v39, %v1016_v56  ;;  %v142_v50 = vsel %vm135_vm14, %v141_v45, 0.0 }
 0x5c0   :  { %v337_v61 = vadd.f32 %v336_v57, %v335_v52  ;;  %v226_v42 = vadd.f32 %v225_v37, %v221_v36  ;;  %v765_v52 = vcvt.f32.s32 %v764_v47  ;;  %v239_v8 = vrot.slane %v904_v13, %v913_v18 }
 0x5c1   :  { %v284_v63 = vadd.f32 %v283_v59, %v279_v54  ;;  %v443_v11 = vadd.f32 %v442_v62, %v441_v53  ;;  %v235_v54 = vrot.slane %v904_v13, %v911_v17  ;;  %v243_v59 = vrot.slane %v904_v13, %v915_v19 }
 0x5c2   :  { %v338_v4 = vrot.slane %v337_v61, 1  ;;  %v227_v49 = vadd.f32 %v226_v42, %v222_v40  ;;  %vm657_vm4 = vcmp.eq.s32.totalorder %v861_v1, %v765_v52  ;;  %v247_v17 = vrot.slane %v904_v13, %v917_v20 }
 0x5c3   :  { %v285_v5 = vadd.f32 %v284_v63, %v280_v58  ;;  %v262_v60 = vmul.f32 %v235_v54, %v981_v7  ;;  %v264_v18 = vmul.f32 %v243_v59, %v991_v41  ;;  %v255_v7 = vrot.slane %v904_v13, %v921_v22 }
 0x5c4   :  { %v339_v10 = vadd.f32 %v338_v4, %v337_v61  ;;  %v228_v12 = vadd.f32 %v227_v49, %v223_v48  ;;  %v263_v61 = vmul.f32 %v239_v8, %v986_v9 }
 0x5c5   :  { %286 = vadd.xlane.f32.xlu0 %v285_v5  ;;  %v267_v41 = vmul.f32 %v255_v7, %v1016_v56 }
 0x5c6   :  { %766 = vpush %v339_v10  ;;  %v268_v4 = vadd.f32 %v263_v61, %v262_v60  ;;  %v265_v10 = vmul.f32 %v247_v17, %v1002_v46 }
 0x5c7   :  { %768 = vpush %v391_v6  ;;  %v251_v6 = vrot.slane %v904_v13, %v919_v21 }
 0x5c8   :  { %770 = vpush %v443_v11  ;;  %v269_v19 = vadd.f32 %v268_v4, %v264_v18 }
 0x5c9   :  { %v266_v9 = vmul.f32 %v251_v6, %v1009_v51 }
 0x5ca   :  { %v270_v11 = vadd.f32 %v269_v19, %v265_v10 }
 0x5cc   :  { %v271_v15 = vadd.f32 %v270_v11, %v266_v9 }
 0x5ce   :  { %v272_v46 = vadd.f32 %v271_v15, %v267_v41 }
 0x5f7   :  { %s767_s2 = spop %766 }
 0x5f8   :  { %s769_s17 = spop %768  ;;  %v446_v51 = vstv %s767_s2 }
 0x5f9   :  { %v449_v23 = vstv %s769_s17  ;;  %s771_s18 = spop %770 }
 0x67b   :  { %v641_v26 = vpop.f32.mrf.mxu0 }
 0x67c   :  { %v646_v28 = vsel %vm645_vm2, %v641_v26, -1e+30  ;;  %v452_v26 = vstv %s771_s18 }
 0x67d   :  { %647 = vmax.xlane.f32.xlu1 %v646_v28  ;;  %v761_v29 = vpop.f32.mrf.mxu0  ;;  %v658_v53 = vsel %vm657_vm4, %v646_v28, 0.0 }
 0x681   :  { %137 = vadd.xlane.f32.xlu1 %v136_v34 }
 0x685   :  { %181 = vadd.xlane.f32.xlu1 %v180_v38 }
 0x689   :  { %166 = vadd.xlane.f32.xlu1 %v165_v44 }
 0x68d   :  { %143 = vadd.xlane.f32.xlu1 %v142_v50 }
 0x691   :  { %229 = vadd.xlane.f32.xlu1 %v228_v12 }
 0x695   :  { %659 = vadd.xlane.f32.xlu1 %v658_v53 }
 0x706   :  { %v1059_v55 = vpop.xlane.xlu1 %647 }
 0x707   :  { %v649_v57 = vsub.f32 %v646_v28, %v1059_v55  ;;  %v287_v28 = vpop.xlane.xlu0 %286 }
 0x708   :  { %vm464_vm6 = vcmp.eq.f32.partialorder %v287_v28, inf  ;;  %vm466_vm7 = vcmp.eq.f32.partialorder %v287_v28, 0.0  ;;  %v467_v36 = vand.u32 2147483648, %v287_v28 }
 0x709   :  { %v650_v58 = vmul.f32 1.442695, %v649_v57 }
 0x70a   :  { %v138_v62 = vpop.xlane.xlu1 %137 }
 0x70b   :  { %785 = vpow2.f32 %v650_v58  ;;  %v762_v63 = vtrunc.f32 %v138_v62 }
 0x70c   :  { %787 = vrsqrt.f32 %v287_v28 }
 0x70d   :  { %v763_v5 = vcvt.f32.s32 %v762_v63 }
 0x70e   :  { %v182_v16 = vpop.xlane.xlu1 %181 }
 0x70f   :  { %vm171_vm5 = vcmp.eq.s32.totalorder %v861_v1, %v763_v5  ;;  %v184_v0 = vmul.f32 0.0625, %v182_v16 }
 0x710   :  { %v172_v20 = vsel %vm171_vm5, %v866_v2, 0.0 }
 0x711   :  { %v173_v21 = vsel %vm158_vm1, %v172_v20, 0.0  ;;  %v445_v13 = vmul.f32 %v184_v0, %v184_v0  ;;  %v448_v22 = vmul.f32 2.0, %v184_v0 }
 0x712   :  { %v167_v34 = vpop.xlane.xlu1 %166 }
 0x713   :  { %v447_v24 = vmul.f32 %v446_v51, %v445_v13  ;;  %v450_v2 = vmul.f32 %v449_v23, %v448_v22 }
 0x715   :  { %v451_v25 = vadd.f32 %v450_v2, %v447_v24 }
 0x716   :  { %v144_v45 = vpop.xlane.xlu1 %143 }
 0x717   :  { %v453_v56 = vadd.f32 %v452_v26, %v451_v25  ;;  %v177_v48 = vsub.f32 1.0, %v144_v45 }
 0x718   :  { %v786_v14 = vpop.eup %785 }
 0x719   :  { %652 = vadd.xlane.f32.xlu0 %v786_v14  ;;  %v454_v27 = vmax.f32 %v453_v56, 0.0  ;;  %v788_v29 = vpop.eup %787  ;;  %v178_v50 = vadd.f32 1.0, %v177_v48 }
 0x71a   :  { %v463_v32 = vmul.f32 %v788_v29, %v287_v28  ;;  %v230_v54 = vpop.xlane.xlu1 %229 }
 0x71b   :  { %789 = vrsqrt.f32 %v454_v27  ;;  %vm457_vm1 = vcmp.eq.f32.partialorder %v454_v27, inf  ;;  %v460_v35 = vand.u32 2147483648, %v454_v27  ;;  %vm459_vm8 = vcmp.eq.f32.partialorder %v454_v27, 0.0 }
 0x71c   :  { %791 = vlog2.f32 %v167_v34  ;;  %v465_v38 = vsel %vm464_vm6, %v287_v28, %v463_v32  ;;  %v469_v8 = vmul.f32 %v230_v54, %v184_v0 }
 0x71d   :  { %174 = vadd.xlane.f32.xlu0 %v173_v21  ;;  %v468_v39 = vsel %vm466_vm7, %v467_v36, %v465_v38 }
 0x71e   :  { %v472_v42 = vmax.f32 %v468_v39, 1e-12  ;;  %v660_v5 = vpop.xlane.xlu1 %659 }
 0x721   :  { %273 = vadd.xlane.f32.xlu0 %v272_v46 }
 0x728   :  { %v790_v30 = vpop.eup %789 }
 0x729   :  { %v456_v31 = vmul.f32 %v790_v30, %v454_v27  ;;  %v792_v44 = vpop.eup %791 }
 0x72a   :  { %v169_v47 = vmul.f32 0.6931472, %v792_v44 }
 0x72b   :  { %v458_v37 = vsel %vm457_vm1, %v454_v27, %v456_v31 }
 0x72c   :  { %v461_v3 = vsel %vm459_vm8, %v460_v35, %v458_v37  ;;  %v170_v52 = vadd.f32 %v169_v47, %v976_v33 }
 0x72d   :  { %v471_v40 = vmax.f32 %v461_v3, 1e-12 }
 0x72f   :  { %v473_v43 = vmul.f32 %v472_v42, %v471_v40 }
 0x731   :  { %793 = vrcp.f32 %v473_v43 }
 0x73e   :  { %v794_v62 = vpop.eup %793 }
 0x7a2   :  { %v653_v49 = vpop.xlane.xlu0 %652 }
 0x7a3   :  { %795 = vlog2.f32 %v653_v49 }
 0x7a6   :  { %v175_v12 = vpop.xlane.xlu0 %174 }
 0x7a7   :  { %v176_v53 = vsub.f32 %v170_v52, %v175_v12 }
 0x7a9   :  { %v663_v57 = vsel %vm662_vm9, %v176_v53, 0.0  ;;  %v179_v58 = vmul.f32 %v178_v50, %v176_v53 }
 0x7aa   :  { %v274_v59 = vpop.xlane.xlu0 %273  ;;  %664 = vadd.xlane.f32.xlu0 %v663_v57 }
 0x7ab   :  { %v470_v60 = vadd.f32 %v469_v8, %v274_v59  ;;  %v673_v61 = vsel %vm662_vm9, %v179_v58, 0.0 }
 0x7ac   :  { %674 = vadd.xlane.f32.xlu1 %v673_v61 }
 0x7ad   :  { %v475_v63 = vmul.f32 %v794_v62, %v470_v60 }
 0x7af   :  { %v683_v17 = vsel %vm662_vm9, %v475_v63, 0.0 }
 0x7b0   :  { %v796_v18 = vpop.eup %795  ;;  %684 = vadd.xlane.f32.xlu0 %v683_v17 }
 0x7b1   :  { %v655_v33 = vmul.f32 0.6931472, %v796_v18 }
 0x7b3   :  { %v656_v4 = vadd.f32 %v655_v33, %v1059_v55 }
 0x7b5   :  { %v661_v6 = vsub.f32 %v656_v4, %v660_v5 }
 0x7b7   :  { %v693_v10 = vsel %vm662_vm9, %v661_v6, 0.0 }
 0x7b8   :  { %694 = vadd.xlane.f32.xlu1 %v693_v10 }
 0x833   :  { %v665_v19 = vpop.xlane.xlu0 %664 }
 0x834   :  { %v666_v7 = vrot.slane %v665_v19, 4 }
 0x835   :  { %v675_v9 = vpop.xlane.xlu1 %674 }
 0x836   :  { %v667_v11 = vadd.f32 %v666_v7, %v665_v19  ;;  %v676_v20 = vrot.slane %v675_v9, 4 }
 0x838   :  { %v668_v14 = vrot.slane %v667_v11, 2  ;;  %v677_v41 = vadd.f32 %v676_v20, %v675_v9 }
 0x839   :  { %v685_v15 = vpop.xlane.xlu0 %684 }
 0x83a   :  { %v678_v21 = vrot.slane %v677_v41, 2  ;;  %v686_v46 = vrot.slane %v685_v15, 4  ;;  %v669_v16 = vadd.f32 %v668_v14, %v667_v11 }
 0x83c   :  { %v687_v0 = vadd.f32 %v686_v46, %v685_v15  ;;  %v670_v13 = vrot.slane %v669_v16, 1  ;;  %v679_v22 = vadd.f32 %v678_v21, %v677_v41 }
 0x83e   :  { %v688_v55 = vrot.slane %v687_v0, 2  ;;  %v671_v51 = vadd.f32 %v670_v13, %v669_v16  ;;  %v680_v23 = vrot.slane %v679_v22, 1 }
 0x840   :  { %v689_v24 = vadd.f32 %v688_v55, %v687_v0  ;;  %772 = vpush %v671_v51  ;;  %v681_v2 = vadd.f32 %v680_v23, %v679_v22 }
 0x841   :  { %v695_v25 = vpop.xlane.xlu1 %694 }
 0x842   :  { %v696_v26 = vrot.slane %v695_v25, 4  ;;  %774 = vpush %v681_v2  ;;  %v690_v56 = vrot.slane %v689_v24, 1 }
 0x844   :  { %v697_v27 = vadd.f32 %v696_v26, %v695_v25  ;;  %v691_v28 = vadd.f32 %v690_v56, %v689_v24 }
 0x846   :  { %v698_v29 = vrot.slane %v697_v27, 2  ;;  %776 = vpush %v691_v28 }
 0x848   :  { %v699_v30 = vadd.f32 %v698_v29, %v697_v27 }
 0x84a   :  { %v700_v31 = vrot.slane %v699_v30, 1 }
 0x84c   :  { %v701_v32 = vadd.f32 %v700_v31, %v699_v30 }
 0x84e   :  { %778 = vpush %v701_v32 }
 0x871   :  { %s773_s19 = spop %772 }
 0x872   :  { %v704_v35 = vstv %s773_s19 }
 0x873   :  { %s775_s20 = spop %774  ;;  %v705_v38 = vsel %vm133_vm0, %v704_v35, 0.0 }
 0x874   :  { %v706_v34 = vstv %s775_s20 }
 0x875   :  { %v707_v37 = vsel %vm140_vm3, %v706_v34, 0.0 }
 0x876   :  { %v708_v39 = vadd.f32 %v707_v37, %v705_v38 }
 0x877   :  { %s777_s21 = spop %776 }
 0x878   :  { %v709_v36 = vstv %s777_s21 }
 0x879   :  { %v710_v3 = vsel %vm145_vm13, %v709_v36, 0.0 }
 0x87a   :  { %v711_v40 = vadd.f32 %v710_v3, %v708_v39 }
 0x87f   :  { %s779_s22 = spop %778 }
 0x880   :  { %v713_v42 = vstv %s779_s22 }
 0x881   :  { %v714_v43 = vsel %vm712_vm10, %v713_v42, 0.0 }
 0x882   :  { %v715_v44 = vadd.f32 %v714_v43, %v711_v40 }
 0x884   :  { %722 = vst [vmem:[%s1101_s6] sm:$0xff] %v715_v44 }
 0x885   :  { %727 = vsyncpa [#allocation5], 1 }

</bundles_post_ra>
